<compile_context>
chip_gen: v7x
topology: tpu7x:2x2x1
jax: 0.10.0
libtpu: 0.0.40
codegen_flags: <defaults>
</compile_context>

<pallas_src>
import jax
import jax.numpy as jnp
from jax.experimental import pallas as pl
from jax.experimental.pallas import tpu as pltpu


LEAKY_SLOPE = 0.2  # the reference module uses F.leaky_relu(x, 0.2)


def _leaky_relu(x, slope=LEAKY_SLOPE):
    return jnp.where(x > 0, x, slope * x)


# ---------------- fused (both branches) PointNet feature extractor ----------
def _pointnet_kernel(x_ref, w1_ref, b1_ref, w2_ref, b2_ref, w3_ref, b3_ref,
                     feat_ref, max_ref):
    t = pl.program_id(1)

    @pl.when(t == 0)
    def _():
        max_ref[...] = jnp.full_like(max_ref, -jnp.inf)

    xb = x_ref[...]                              # (B, Nt, Cin) f32
    B, Nt, Cin = xb.shape
    xf = xb.reshape(B * Nt, Cin)                 # flatten batch into matmul M

    # Layer 1: Cin is tiny (3) -> VPU broadcast-MAC, keep the MXU free.
    w1 = w1_ref[0]                               # (Cin, 64) f32 (BN folded)
    h1 = xf[:, 0:1] * w1[0:1, :]
    for c in range(1, Cin):                      # static unroll, Cin small
        h1 = h1 + xf[:, c:c + 1] * w1[c:c + 1, :]
    h1 = _leaky_relu(h1 + b1_ref[0])             # (B*Nt, 64) f32

    # Layers 2/3: bf16 MXU matmuls with f32 accumulate + f32 elementwise.
    h2 = jnp.dot(h1.astype(jnp.bfloat16), w2_ref[0],
                 preferred_element_type=jnp.float32)
    h2 = _leaky_relu(h2 + b2_ref[0])             # (B*Nt, 128) f32
    h3 = jnp.dot(h2.astype(jnp.bfloat16), w3_ref[0],
                 preferred_element_type=jnp.float32) + b3_ref[0]  # (B*Nt, 1024)

    # Running per-batch max over the point tiles processed so far.
    h3 = h3.reshape(B, Nt, h3.shape[-1])
    max_ref[...] = jnp.maximum(max_ref[...], jnp.max(h3, axis=1))

    @pl.when(t == pl.num_programs(1) - 1)
    def _():
        feat_ref[0] = max_ref[...]


def _choose_n_tile(n, batch, row_cap=2048):
    """Largest point-tile (multiple of 8, dividing n) with batch*tile <= cap."""
    cap = max(8, row_cap // max(batch, 1))
    if n <= cap:
        return n
    tile = 0
    for t in range(8, cap + 1, 8):
        if n % t == 0:
            tile = t
    return tile if tile > 0 else n


def pointnet_fused_forward(x, params_p, params_n):
    """Run both PointNet branches in a single pallas_call -> (2, B, 1024)."""
    B, N, Cin = x.shape
    stacked = [jnp.stack([p, q]) for p, q in zip(params_p, params_n)]
    w1, b1, w2, b2, w3, b3 = stacked

    Nt = _choose_n_tile(N, B)
    T = N // Nt

    weight_specs = [
        pl.BlockSpec((1,) + tuple(w.shape[1:]), lambda br, t: (br, 0, 0))
        for w in stacked
    ]

    feat = pl.pallas_call(
        _pointnet_kernel,
        out_shape=jax.ShapeDtypeStruct((2, B, 1024), jnp.float32),
        grid=(2, T),
        in_specs=[pl.BlockSpec((B, Nt, Cin), lambda br, t: (0, t, 0))]
                 + weight_specs,
        out_specs=pl.BlockSpec((1, B, 1024), lambda br, t: (br, 0, 0)),
        scratch_shapes=[pltpu.VMEM((B, 1024), jnp.float32)],
        compiler_params=pltpu.CompilerParams(
            dimension_semantics=("parallel", "arbitrary")),
    )(x, w1, b1, w2, b2, w3, b3)
    return feat


# ----------------------------- PoseNet kernel ------------------------------
def _posenet_kernel(feat_ref, w1_ref, b1_ref, w2_ref, b2_ref, w3_ref, b3_ref,
                    out_ref):
    fp = feat_ref[0]                              # (B, 1024) p-branch features
    fn = feat_ref[1]                              # (B, 1024) n-branch features
    # concat(fp, fn) @ W1  ==  fp @ W1[:1024] + fn @ W1[1024:]  (no HBM concat)
    h = (jnp.dot(fp.astype(jnp.bfloat16), w1_ref[0],
                 preferred_element_type=jnp.float32)
         + jnp.dot(fn.astype(jnp.bfloat16), w1_ref[1],
                   preferred_element_type=jnp.float32))
    h = _leaky_relu(h + b1_ref[...])
    h = jnp.dot(h.astype(jnp.bfloat16), w2_ref[...],
                preferred_element_type=jnp.float32)
    h = _leaky_relu(h + b2_ref[...])
    # final head is padded to 128 output lanes -> lane-dense store
    out_ref[...] = (jnp.dot(h, w3_ref[...],
                            preferred_element_type=jnp.float32) + b3_ref[...])


def posenet_forward(feat, pose_params):
    B = feat.shape[1]
    pad_out = pose_params[4].shape[1]
    n_args = 1 + len(pose_params)
    return pl.pallas_call(
        _posenet_kernel,
        out_shape=jax.ShapeDtypeStruct((B, pad_out), jnp.float32),
        in_specs=[pl.BlockSpec(memory_space=pltpu.MemorySpace.VMEM)] * n_args,
        out_specs=pl.BlockSpec(memory_space=pltpu.MemorySpace.VMEM),
    )(feat, *pose_params)


# --------------------------- parameter utilities ---------------------------
def _fold_bn(w, b, gamma, beta, mean, var, eps=1e-5):
    """Fold eval-mode BatchNorm into a linear layer y = x @ w + b."""
    scale = gamma / jnp.sqrt(var + eps)
    return w * scale[None, :], (b - mean[None, :]) * scale[None, :] + beta[None, :]


def _linear_init(key, cin, cout):
    kw, kb = jax.random.split(key)
    w = jax.random.normal(kw, (cin, cout), jnp.float32) * (1.0 / jnp.sqrt(cin))
    b = jax.random.normal(kb, (1, cout), jnp.float32) * 0.01
    return w, b


def _bn_init(key, c):
    kg, kb, km, kv = jax.random.split(key, 4)
    gamma = 1.0 + 0.1 * jax.random.normal(kg, (c,), jnp.float32)
    beta = 0.1 * jax.random.normal(kb, (c,), jnp.float32)
    mean = 0.1 * jax.random.normal(km, (c,), jnp.float32)
    var = 1.0 + 0.1 * jax.random.uniform(kv, (c,), jnp.float32)
    return gamma, beta, mean, var


def make_pointnet_params(key, input_dims=3):
    dims = [input_dims, 64, 128, 1024]
    params = []
    for i in range(3):
        key, k1, k2 = jax.random.split(key, 3)
        w, b = _linear_init(k1, dims[i], dims[i + 1])
        g, bt, m, v = _bn_init(k2, dims[i + 1])
        w, b = _fold_bn(w, b, g, bt, m, v)       # conv_i is followed by bn_i
        if i > 0:
            w = w.astype(jnp.bfloat16)           # MXU layers run bf16
        params.extend([w, b])
    return tuple(params)


def make_posenet_params(key, input_dims=2048, output_dims=6, pad_out=128):
    k1, kb1, k2, kb2, k3 = jax.random.split(key, 5)
    w1, b1 = _linear_init(k1, input_dims, 256)
    w1, b1 = _fold_bn(w1, b1, *_bn_init(kb1, 256))   # fc1 -> (dropout) -> bn1
    w2, b2 = _linear_init(k2, 256, 64)
    w2, b2 = _fold_bn(w2, b2, *_bn_init(kb2, 64))    # fc2 -> (dropout) -> bn2
    w3, b3 = _linear_init(k3, 64, output_dims)

    half = input_dims // 2
    w1s = jnp.stack([w1[:half], w1[half:]]).astype(jnp.bfloat16)  # (2, half, 256)
    w2 = w2.astype(jnp.bfloat16)
    # pad the 6-wide head to 128 lanes so the kernel store is lane-dense
    w3p = jnp.zeros((w3.shape[0], pad_out), jnp.float32).at[:, :output_dims].set(w3)
    b3p = jnp.zeros((1, pad_out), jnp.float32).at[:, :output_dims].set(b3)
    return (w1s, b1, w2, b2, w3p, b3p)


# ------------------------------ HalfSplit -----------------------------------
def half_split_forward(x, p_params, n_params, pose_params, output_dims=6):
    feat = pointnet_fused_forward(x, p_params, n_params)   # (2, B, 1024)
    pred_pad = posenet_forward(feat, pose_params)           # (B, 128) padded
    pred_pn = pred_pad[:, :output_dims]                     # (B, 6)
    feat_p, feat_n = feat[0], feat[1]
    return pred_pn[:, :3], feat_p, pred_pn[:, 3:], feat_n


if __name__ == "__main__":
    key = jax.random.PRNGKey(0)
    kx, kp, kn, kpose = jax.random.split(key, 4)

    B, N, C = 2, 16, 3
    x = jax.random.normal(kx, (B, N, C), jnp.float32)

    p_params = make_pointnet_params(kp, input_dims=C)
    n_params = make_pointnet_params(kn, input_dims=C)
    pose_params = make_posenet_params(kpose, input_dims=2048, output_dims=6)

    rot, feat_p, trans, feat_n = half_split_forward(x, p_params, n_params,
                                                    pose_params)
    jax.block_until_ready((rot, feat_p, trans, feat_n))

    assert rot.shape == (B, 3)
    assert trans.shape == (B, 3)
    assert feat_p.shape == (B, 1024)
    assert feat_n.shape == (B, 1024)
    assert bool(jnp.all(jnp.isfinite(rot))) and bool(jnp.all(jnp.isfinite(trans)))
    print("KERNEL_OK")
</pallas_src>

<mosaic_0001>
module attributes {stable_mosaic.version = 11 : i64} {
  func.func @_pointnet_kernel(%arg0: i32, %arg1: i32, %arg2: memref<2x16x3xf32, #tpu.memory_space<vmem>>, %arg3: memref<1x3x64xf32, #tpu.memory_space<vmem>>, %arg4: memref<1x1x64xf32, #tpu.memory_space<vmem>>, %arg5: memref<1x64x128xbf16, #tpu.memory_space<vmem>>, %arg6: memref<1x1x128xf32, #tpu.memory_space<vmem>>, %arg7: memref<1x128x1024xbf16, #tpu.memory_space<vmem>>, %arg8: memref<1x1x1024xf32, #tpu.memory_space<vmem>>, %arg9: memref<1x2x1024xf32, #tpu.memory_space<vmem>>, %arg10: memref<2x1024xf32, #tpu.memory_space<vmem>>) attributes {dimension_semantics = [#tpu.dimension_semantics<parallel>, #tpu.dimension_semantics<arbitrary>], iteration_bounds = array<i64: 2, 1>, scalar_prefetch = 0 : i64, scratch_operands = 1 : i64, tpu.core_type = #tpu.core_type<tc>, window_params = [{transform_indices = @transform_0, window_bounds = array<i64: 2, 16, 3>}, {transform_indices = @transform_1, window_bounds = array<i64: 1, 3, 64>}, {transform_indices = @transform_2, window_bounds = array<i64: 1, 1, 64>}, {transform_indices = @transform_3, window_bounds = array<i64: 1, 64, 128>}, {transform_indices = @transform_4, window_bounds = array<i64: 1, 1, 128>}, {transform_indices = @transform_5, window_bounds = array<i64: 1, 128, 1024>}, {transform_indices = @transform_6, window_bounds = array<i64: 1, 1, 1024>}, {transform_indices = @transform_7, window_bounds = array<i64: 1, 2, 1024>}]} {
    %c0_i32 = arith.constant 0 : i32
    %0 = arith.cmpi eq, %arg1, %c0_i32 : i32
    %1 = arith.extui %0 : i1 to i32
    %c0_i32_0 = arith.constant 0 : i32
    %2 = arith.cmpi ne, %1, %c0_i32_0 : i32
    scf.if %2 {
      %cst_33 = arith.constant 0xFF800000 : f32
      %62 = vector.broadcast %cst_33 : f32 to vector<2x1024xf32>
      %c0_34 = arith.constant 0 : index
      %c0_35 = arith.constant 0 : index
      %63 = vector.load %arg10[%c0_34, %c0_35] : memref<2x1024xf32, #tpu.memory_space<vmem>>, vector<2x1024xf32>
      tpu.vector_store %arg10[%c0_34, %c0_35], %62 {strides = array<i32>} : memref<2x1024xf32, #tpu.memory_space<vmem>>, vector<2x1024xf32>,
    } else {
    }
    %c0 = arith.constant 0 : index
    %c0_1 = arith.constant 0 : index
    %c0_2 = arith.constant 0 : index
    %3 = vector.load %arg2[%c0, %c0_1, %c0_2] : memref<2x16x3xf32, #tpu.memory_space<vmem>>, vector<2x16x3xf32>
    %4 = vector.shape_cast %3 : vector<2x16x3xf32> to vector<32x3xf32>
    %c0_3 = arith.constant 0 : index
    %c0_4 = arith.constant 0 : index
    %c0_5 = arith.constant 0 : index
    %5 = vector.load %arg3[%c0_3, %c0_4, %c0_5] : memref<1x3x64xf32, #tpu.memory_space<vmem>>, vector<1x3x64xf32>
    %6 = vector.shape_cast %5 : vector<1x3x64xf32> to vector<3x64xf32>
    %7 = vector.extract_strided_slice %4 {offsets = [0, 0], sizes = [32, 1], strides = [1, 1]} : vector<32x3xf32> to vector<32x1xf32>
    %8 = vector.extract_strided_slice %6 {offsets = [0, 0], sizes = [1, 64], strides = [1, 1]} : vector<3x64xf32> to vector<1x64xf32>
    %9 = vector.broadcast %7 : vector<32x1xf32> to vector<32x64xf32>
    %10 = vector.broadcast %8 : vector<1x64xf32> to vector<32x64xf32>
    %11 = arith.mulf %9, %10 : vector<32x64xf32>
    %12 = vector.extract_strided_slice %4 {offsets = [0, 1], sizes = [32, 1], strides = [1, 1]} : vector<32x3xf32> to vector<32x1xf32>
    %13 = vector.extract_strided_slice %6 {offsets = [1, 0], sizes = [1, 64], strides = [1, 1]} : vector<3x64xf32> to vector<1x64xf32>
    %14 = vector.broadcast %12 : vector<32x1xf32> to vector<32x64xf32>
    %15 = vector.broadcast %13 : vector<1x64xf32> to vector<32x64xf32>
    %16 = arith.mulf %14, %15 : vector<32x64xf32>
    %17 = arith.addf %11, %16 : vector<32x64xf32>
    %18 = vector.extract_strided_slice %4 {offsets = [0, 2], sizes = [32, 1], strides = [1, 1]} : vector<32x3xf32> to vector<32x1xf32>
    %19 = vector.extract_strided_slice %6 {offsets = [2, 0], sizes = [1, 64], strides = [1, 1]} : vector<3x64xf32> to vector<1x64xf32>
    %20 = vector.broadcast %18 : vector<32x1xf32> to vector<32x64xf32>
    %21 = vector.broadcast %19 : vector<1x64xf32> to vector<32x64xf32>
    %22 = arith.mulf %20, %21 : vector<32x64xf32>
    %23 = arith.addf %17, %22 : vector<32x64xf32>
    %c0_6 = arith.constant 0 : index
    %c0_7 = arith.constant 0 : index
    %c0_8 = arith.constant 0 : index
    %24 = vector.load %arg4[%c0_6, %c0_7, %c0_8] : memref<1x1x64xf32, #tpu.memory_space<vmem>>, vector<1x1x64xf32>
    %25 = vector.shape_cast %24 : vector<1x1x64xf32> to vector<1x64xf32>
    %26 = vector.broadcast %25 : vector<1x64xf32> to vector<32x64xf32>
    %27 = arith.addf %23, %26 : vector<32x64xf32>
    %cst = arith.constant 0.000000e+00 : f32
    %28 = vector.broadcast %cst : f32 to vector<32x64xf32>
    %29 = arith.cmpf ogt, %27, %28 : vector<32x64xf32>
    %cst_9 = arith.constant 2.000000e-01 : f32
    %30 = vector.broadcast %cst_9 : f32 to vector<32x64xf32>
    %31 = arith.mulf %30, %27 : vector<32x64xf32>
    %32 = arith.select %29, %27, %31 : vector<32x64xi1>, vector<32x64xf32>
    %33 = arith.truncf %32 : vector<32x64xf32> to vector<32x64xbf16>
    %c0_10 = arith.constant 0 : index
    %c0_11 = arith.constant 0 : index
    %c0_12 = arith.constant 0 : index
    %34 = vector.load %arg5[%c0_10, %c0_11, %c0_12] : memref<1x64x128xbf16, #tpu.memory_space<vmem>>, vector<1x64x128xbf16>
    %35 = vector.shape_cast %34 : vector<1x64x128xbf16> to vector<64x128xbf16>
    %cst_13 = arith.constant dense<0.000000e+00> : vector<32x128xf32>
    %36 = tpu.matmul %33, %35, %cst_13 {dimension_numbers = #tpu.dot_dimension_numbers<[1], [0], [0], [1], [0, 0, 1, 1], [], []>} : vector<32x64xbf16>, vector<64x128xbf16>, vector<32x128xf32> -> vector<32x128xf32>
    %c0_14 = arith.constant 0 : index
    %c0_15 = arith.constant 0 : index
    %c0_16 = arith.constant 0 : index
    %37 = vector.load %arg6[%c0_14, %c0_15, %c0_16] : memref<1x1x128xf32, #tpu.memory_space<vmem>>, vector<1x1x128xf32>
    %38 = vector.shape_cast %37 : vector<1x1x128xf32> to vector<1x128xf32>
    %39 = vector.broadcast %38 : vector<1x128xf32> to vector<32x128xf32>
    %40 = arith.addf %36, %39 : vector<32x128xf32>
    %cst_17 = arith.constant 0.000000e+00 : f32
    %41 = vector.broadcast %cst_17 : f32 to vector<32x128xf32>
    %42 = arith.cmpf ogt, %40, %41 : vector<32x128xf32>
    %cst_18 = arith.constant 2.000000e-01 : f32
    %43 = vector.broadcast %cst_18 : f32 to vector<32x128xf32>
    %44 = arith.mulf %43, %40 : vector<32x128xf32>
    %45 = arith.select %42, %40, %44 : vector<32x128xi1>, vector<32x128xf32>
    %46 = arith.truncf %45 : vector<32x128xf32> to vector<32x128xbf16>
    %c0_19 = arith.constant 0 : index
    %c0_20 = arith.constant 0 : index
    %c0_21 = arith.constant 0 : index
    %47 = vector.load %arg7[%c0_19, %c0_20, %c0_21] : memref<1x128x1024xbf16, #tpu.memory_space<vmem>>, vector<1x128x1024xbf16>
    %48 = vector.shape_cast %47 : vector<1x128x1024xbf16> to vector<128x1024xbf16>
    %cst_22 = arith.constant dense<0.000000e+00> : vector<32x1024xf32>
    %49 = tpu.matmul %46, %48, %cst_22 {dimension_numbers = #tpu.dot_dimension_numbers<[1], [0], [0], [1], [0, 0, 1, 1], [], []>} : vector<32x128xbf16>, vector<128x1024xbf16>, vector<32x1024xf32> -> vector<32x1024xf32>
    %c0_23 = arith.constant 0 : index
    %c0_24 = arith.constant 0 : index
    %c0_25 = arith.constant 0 : index
    %50 = vector.load %arg8[%c0_23, %c0_24, %c0_25] : memref<1x1x1024xf32, #tpu.memory_space<vmem>>, vector<1x1x1024xf32>
    %51 = vector.shape_cast %50 : vector<1x1x1024xf32> to vector<1x1024xf32>
    %52 = vector.broadcast %51 : vector<1x1024xf32> to vector<32x1024xf32>
    %53 = arith.addf %49, %52 : vector<32x1024xf32>
    %54 = vector.shape_cast %53 : vector<32x1024xf32> to vector<2x16x1024xf32>
    %c0_26 = arith.constant 0 : index
    %c0_27 = arith.constant 0 : index
    %55 = vector.load %arg10[%c0_26, %c0_27] : memref<2x1024xf32, #tpu.memory_space<vmem>>, vector<2x1024xf32>
    %cst_28 = arith.constant dense<0xFF800000> : vector<2x1024xf32>
    %56 = vector.multi_reduction <maximumf>, %54, %cst_28 [1] : vector<2x16x1024xf32> to vector<2x1024xf32>
    %57 = arith.maximumf %55, %56 : vector<2x1024xf32>
    %c0_29 = arith.constant 0 : index
    %c0_30 = arith.constant 0 : index
    %58 = vector.load %arg10[%c0_29, %c0_30] : memref<2x1024xf32, #tpu.memory_space<vmem>>, vector<2x1024xf32>
    tpu.vector_store %arg10[%c0_29, %c0_30], %57 {strides = array<i32>} : memref<2x1024xf32, #tpu.memory_space<vmem>>, vector<2x1024xf32>,
    %c0_i32_31 = arith.constant 0 : i32
    %59 = arith.cmpi eq, %arg1, %c0_i32_31 : i32
    %60 = arith.extui %59 : i1 to i32
    %c0_i32_32 = arith.constant 0 : i32
    %61 = arith.cmpi ne, %60, %c0_i32_32 : i32
    scf.if %61 {
      %c0_33 = arith.constant 0 : index
      %c0_34 = arith.constant 0 : index
      %62 = vector.load %arg10[%c0_33, %c0_34] : memref<2x1024xf32, #tpu.memory_space<vmem>>, vector<2x1024xf32>
      %c0_35 = arith.constant 0 : index
      %c0_36 = arith.constant 0 : index
      %c0_37 = arith.constant 0 : index
      %63 = vector.load %arg9[%c0_35, %c0_36, %c0_37] : memref<1x2x1024xf32, #tpu.memory_space<vmem>>, vector<1x2x1024xf32>
      %64 = vector.shape_cast %63 : vector<1x2x1024xf32> to vector<2x1024xf32>
      %65 = vector.shape_cast %62 : vector<2x1024xf32> to vector<1x2x1024xf32>
      tpu.vector_store %arg9[%c0_35, %c0_36, %c0_37], %65 {strides = array<i32>} : memref<1x2x1024xf32, #tpu.memory_space<vmem>>, vector<1x2x1024xf32>,
    } else {
    }
    return
  }
  func.func @transform_0(%arg0: i32, %arg1: i32) -> (i32, i32, i32) {
    %c0_i32 = arith.constant 0 : i32
    %c0_i32_0 = arith.constant 0 : i32
    %c0_i32_1 = arith.constant 0 : i32
    return %c0_i32, %arg1, %c0_i32_0 : i32, i32, i32
  }
  func.func @transform_1(%arg0: i32, %arg1: i32) -> (i32, i32, i32) {
    %c0_i32 = arith.constant 0 : i32
    %c0_i32_0 = arith.constant 0 : i32
    %c0_i32_1 = arith.constant 0 : i32
    return %arg0, %c0_i32, %c0_i32_0 : i32, i32, i32
  }
  func.func @transform_2(%arg0: i32, %arg1: i32) -> (i32, i32, i32) {
    %c0_i32 = arith.constant 0 : i32
    %c0_i32_0 = arith.constant 0 : i32
    %c0_i32_1 = arith.constant 0 : i32
    return %arg0, %c0_i32, %c0_i32_0 : i32, i32, i32
  }
  func.func @transform_3(%arg0: i32, %arg1: i32) -> (i32, i32, i32) {
    %c0_i32 = arith.constant 0 : i32
    %c0_i32_0 = arith.constant 0 : i32
    %c0_i32_1 = arith.constant 0 : i32
    return %arg0, %c0_i32, %c0_i32_0 : i32, i32, i32
  }
  func.func @transform_4(%arg0: i32, %arg1: i32) -> (i32, i32, i32) {
    %c0_i32 = arith.constant 0 : i32
    %c0_i32_0 = arith.constant 0 : i32
    %c0_i32_1 = arith.constant 0 : i32
    return %arg0, %c0_i32, %c0_i32_0 : i32, i32, i32
  }
  func.func @transform_5(%arg0: i32, %arg1: i32) -> (i32, i32, i32) {
    %c0_i32 = arith.constant 0 : i32
    %c0_i32_0 = arith.constant 0 : i32
    %c0_i32_1 = arith.constant 0 : i32
    return %arg0, %c0_i32, %c0_i32_0 : i32, i32, i32
  }
  func.func @transform_6(%arg0: i32, %arg1: i32) -> (i32, i32, i32) {
    %c0_i32 = arith.constant 0 : i32
    %c0_i32_0 = arith.constant 0 : i32
    %c0_i32_1 = arith.constant 0 : i32
    return %arg0, %c0_i32, %c0_i32_0 : i32, i32, i32
  }
  func.func @transform_7(%arg0: i32, %arg1: i32) -> (i32, i32, i32) {
    %c0_i32 = arith.constant 0 : i32
    %c0_i32_0 = arith.constant 0 : i32
    %c0_i32_1 = arith.constant 0 : i32
    return %arg0, %c0_i32, %c0_i32_0 : i32, i32, i32
  }
}

</mosaic_0001>

<bundles_post_ra>
// kernel: tpu_custom_call.1
= control target key start
LH: loop header
LB: loop body
LE: loop exit
PB: predicated region body
PF: predicated region fallthrough
CT: control target
= control target key end

     0   :  { %s2524_s0 = inlined_call_operand.vmem [shape: f32[2,16,3], index: 0, kind: input, shape index: {}]   ;;  %s2525_s1 = inlined_call_operand.vmem [shape: f32[2,3,64], index: 1, kind: input, shape index: {}]   ;;  %s2526_s2 = inlined_call_operand.vmem [shape: f32[2,1,64], index: 2, kind: input, shape index: {}]   ;;  %s2527_s3 = inlined_call_operand.hbm [shape: bf16[2,64,128], index: 3, kind: input, shape index: {}]   ;;  %s2528_s4 = inlined_call_operand.vmem [shape: f32[2,1,128], index: 4, kind: input, shape index: {}]   ;;  %s2529_s5 = inlined_call_operand.hbm [shape: bf16[2,128,1024], index: 5, kind: input, shape index: {}]   ;;  %s2530_s6 = inlined_call_operand.vmem [shape: f32[2,1,1024], index: 6, kind: input, shape index: {}]   ;;  %s2531_s7 = inlined_call_operand.hbm [shape: f32[2,2,1024], index: 7, kind: output, shape index: {}]  }
   0x1   :  { %2535 = sst [smem:[#allocation14_spill]] %s2527_s3 }
   0x2   :  { %12 = vsyncpa [#allocation4], 0 }
   0x3   :  { %14 = vsyncpa [#allocation4 + $0x1], 0 }
   0x4   :  { %15 = vsyncpa [#allocation7], 0 }
   0x5   :  { %17 = vsyncpa [#allocation7 + $0x1], 0 }
   0x6   :  { %18 = vsyncpa [#allocation5], 0 }
   0x7   :  { %20 = vsyncpa [#allocation5 + $0x1], 0  ;;  %s2105_s24 = smov 0   ;;  %s2107_s25 = smov 0  }
   0x8   :  { %s2109_s26 = smov 0   ;;  %s2111_s27 = smov 0  }
   0x9   :  { %s2113_s28 = smov 0   ;;  %s2115_s29 = smov 0  }
   0xa LB: > { %s1705_s30 = sadd.s32 4294967295, %s2052_s29   ;;  %s1706_s8 = sadd.s32 4294967294, %s2052_s29   ;;  %s2052_s29 = sphi %s2115_s29, %s26_s29   ;;  %s2048_s28 = sphi %s2113_s28, %s2556_s28   ;;  %s2044_s27 = sphi %s2111_s27, %s2555_s27   ;;  %s2040_s26 = sphi %s2109_s26, %s2554_s26   ;;  %s2036_s25 = sphi %s2107_s25, %s2553_s25   ;;  %s2032_s24 = sphi %s2105_s24, %s2552_s24  }
   0xb   : > { %s38_s9 = sadd.s32 1, %s2048_s28  ;;  %s123_s10 = sadd.s32 1, %s2040_s26 }
   0xc   : > { %p40_p0 = scmp.ge.s32.totalorder %s38_s9, 2  ;;  %p130_p1 = scmp.ne.s32.totalorder %s2040_s26, %s2036_s25 }
   0xd   : > { %p131_p2 = scmp.eq.s32.totalorder %s2052_s29, 0  ;;  %p136_p3 = scmp.ne.s32.totalorder %s2036_s25, %s2032_s24 }
   0xe   : > { %s2558_s9 = smov (%p40_p0, %s38_s9), 0  ;;  %p137_p5 = scmp.eq.s32.totalorder %s1705_s30, 0 }
   0xf   : > { %2536 = sst [smem:[#allocation12_spill]] %s2558_s9  ;;  %p2146_p4 = por %p131_p2, %p130_p1 }
  0x10   : > { %s120_s12 = ssub.s32 %s2048_s28, %s2558_s9  ;;  %p238_p6 = scmp.eq.s32.totalorder %s1705_s30, 1 }
  0x11   : > { %p121_p7 = scmp.eq.s32.totalorder %s120_s12, 0  ;;  %p2152_p8 = por %p137_p5, %p136_p3 }
  0x12   : > { %p2156_p9 = por %p238_p6, %p130_p1  ;;  %p244_p10 = scmp.eq.s32.totalorder %s1706_s8, 1 }
  0x13   : > { %s2538_s13 = scalar_select %p2152_p8, 1, 0 }
  0x14   : > { %s2539_s14 = scalar_select %p2156_p9, 1, 0 }
  0x15   : > { %s2161_s15 = scalar_select %p121_p7, %s2040_s26, %s123_s10  }
  0x16   : > { %p2163_p11 = por %p244_p10, %p136_p3  ;;  %p1837_p13 = scmp.lt.s32.totalorder %s2052_s29, 2 }
  0x17   : > { %2540 = sst [smem:[#allocation13_spill]] %s2161_s15  ;;  %s2170_s17 = sand.u32 1, %s2040_s26  }
  0x18   : > { %s2541_s16 = scalar_select %p2163_p11, 1, 0 }
  0x19   : > { %s1710_s18 = sshll.u32 %s2170_s17, 5  ;;  %s1799_s19 = sshll.u32 %s2048_s28, 9 }
  0x1a   : > { %s2542_s3 = sld [smem:[#allocation14_spill]]  ;;  %s290_s23 = scalar_lea.vmem [#allocation3], %s1710_s18 }
  0x1b   : > { %s297_s30 = sshll.u32 %s290_s23, 4  ;;  %p2183_p0 = pnand %p1837_p13, %p2146_p4  ;;  %s2179_s30 = int_to_ptr.vmem [resolvable:$true] %s297_s30 }
  0x1c   : > { %s287_s10 = scalar_lea.sflag [#allocation4], %s2170_s17 }
  0x1d   : > { %p1908_p3 = pneg %p2183_p0 }
  0x20   : > { %s2177_s22 = scalar_lea.hbm %s2542_s3, %s1799_s19  ;;  %s1911_s11 = scalar_lea.hbm %s2542_s3, 1024 }
  0x21   : > { %s1906_s12 = scalar_lea.hbm %s2177_s22, 512  ;;  %p1912_p4 = scmp.lt.u32.totalorder %s2177_s22, %s2542_s3 }
  0x22   : > { %p1907_p2 = scmp.ne.s32.totalorder %s2177_s22, %s1906_s12  ;;  %p1913_p7 = scmp.lt.u32.totalorder %s1911_s11, %s1906_s12 }
  0x23   : > { %p1915_p13 = scmp.lt.u32.totalorder %s1906_s12, %s2177_s22 }
  0x24   : > { %p1909_p5 = pnand %p1908_p3, %p1907_p2  ;;  %p1914_p10 = por %p1913_p7, %p1912_p4 }
  0x26   : > { %p1910_p6 = pneg %p1909_p5  ;;  %p1916_p12 = por %p1915_p13, %p1914_p10 }
  0x28   : > { %p1917_p1 = pnand %p1916_p12, %p1910_p6 }
  0x2a   : > { %1920 = shalt.err (!%p1917_p1)
}
  0x2b   : > { %s1921_s23 = scalar_lea.vmem %s2179_s30, 512  ;;  %s2054_s18 = smov [#allocation3]  }
  0x2c   : > { %p1922_p2 = scmp.ne.s32.totalorder %s2179_s30, %s1921_s23  ;;  %s1926_s19 = sshll.u32 %s2054_s18, 4  ;;  %s1927_s19 = int_to_ptr.vmem [resolvable:$false] %s1926_s19 }
  0x2d   : > { %s1928_s20 = scalar_lea.vmem %s1927_s19, 1024  ;;  %p1929_p9 = scmp.lt.s32.totalorder %s2179_s30, %s1927_s19 }
  0x2e   : > { %p1924_p5 = pnand %p1922_p2, %p1908_p3  ;;  %p1930_p4 = scmp.lt.s32.totalorder %s1928_s20, %s1921_s23 }
  0x30   : > { %p1925_p11 = pneg %p1924_p5  ;;  %p1931_p7 = por %p1930_p4, %p1929_p9 }
  0x32   : > { %p1932_p10 = pnand %p1931_p7, %p1925_p11 }
  0x34   : > { %1935 = shalt.err (!%p1932_p10)
}
  0x35   : > { %s2055_s12 = smov 64   ;;  %s2056_s11 = smov 4  }
  0x36   : > { %1829 = dma.hbm_to_vmem [thread:$0]  (!%p2183_p0), %s2177_s22, 512, %s2179_s30, %s287_s10, %s2055_s12, %s2055_s12, %s2056_s11  }
  0x37   : > { %p339_p12 = scmp.lt.s32.totalorder %s2052_s29, 3  ;;  %s1713_s21 = sshll.u32 %s2170_s17, 9 }
  0x38   : > { %s1800_s23 = sshll.u32 %s2048_s28, 13  ;;  %p2544_p9 = scmp.ge.s32.totalorder %s2052_s29, 1 }
  0x39   : > { %s2228_s3 = scalar_lea.hbm %s2529_s5, %s1800_s23  ;;  %s317_s9 = scalar_lea.vmem [#allocation6], %s1713_s21 }
  0x3a   : > { %p2221_p11 = pnand %p2544_p9, %p339_p12  ;;  %s324_s15 = sshll.u32 %s317_s9, 4  ;;  %s2230_s15 = int_to_ptr.vmem [resolvable:$true] %s324_s15 }
  0x3b   : > { %s314_s22 = scalar_lea.sflag [#allocation7], %s2170_s17  ;;  %s1936_s30 = scalar_lea.hbm %s2228_s3, 8192 }
  0x3c   : > { %p1937_p1 = scmp.ne.s32.totalorder %s2228_s3, %s1936_s30  ;;  %s1941_s11 = scalar_lea.hbm %s2529_s5, 16384 }
  0x3d   : > { %p1942_p2 = scmp.lt.u32.totalorder %s2228_s3, %s2529_s5  ;;  %p1943_p5 = scmp.lt.u32.totalorder %s1941_s11, %s1936_s30 }
  0x3e   : > { %p1939_p6 = pnand %p1937_p1, %p1908_p3  ;;  %p1945_p7 = scmp.lt.u32.totalorder %s1936_s30, %s2228_s3 }
  0x3f   : > { %p1944_p4 = por %p1943_p5, %p1942_p2 }
  0x40   : > { %p1940_p13 = pneg %p1939_p6 }
  0x41   : > { %p1946_p10 = por %p1945_p7, %p1944_p4 }
  0x43   : > { %p1947_p12 = pnand %p1946_p10, %p1940_p13 }
  0x45   : > { %1950 = shalt.err (!%p1947_p12)
}
  0x46   : > { %s1951_s9 = scalar_lea.vmem %s2230_s15, 8192  ;;  %s2057_s21 = smov [#allocation6]  }
  0x47   : > { %p1952_p9 = scmp.ne.s32.totalorder %s2230_s15, %s1951_s9  ;;  %s1956_s20 = sshll.u32 %s2057_s21, 4  ;;  %s1957_s20 = int_to_ptr.vmem [resolvable:$false] %s1956_s20 }
  0x48   : > { %s1958_s10 = scalar_lea.vmem %s1957_s20, 16384  ;;  %p1959_p8 = scmp.lt.s32.totalorder %s2230_s15, %s1957_s20 }
  0x49   : > { %p1954_p1 = pnand %p1952_p9, %p1908_p3  ;;  %p1960_p2 = scmp.lt.s32.totalorder %s1958_s10, %s1951_s9 }
  0x4b   : > { %p1955_p6 = pneg %p1954_p1  ;;  %p1961_p5 = por %p1960_p2, %p1959_p8 }
  0x4d   : > { %p1962_p4 = pnand %p1961_p5, %p1955_p6 }
  0x4f   : > { %1965 = shalt.err (!%p1962_p4)
}
  0x50   : > { %s2058_s30 = smov 512   ;;  %s2059_s12 = smov 32  }
  0x51   : > { %1832 = dma.hbm_to_vmem [thread:$0]  (!%p2183_p0), %s2228_s3, 8192, %s2230_s15, %s314_s22, %s2058_s30, %s2058_s30, %s2059_s12  }
  0x52   : > { %343 = sbr.rel (%p2221_p11) target bundleno = 780 (0x30c), region = 48  ;;  %s2261_s11 = sand.u32 (!%p2221_p11), 1, %s2036_s25  }
  0x53   : > { %s1717_s23 = sshll.u32 (!%p2221_p11), %s2261_s11, 5  ;;  %s346_s19 = scalar_lea.sflag (!%p2221_p11), [#allocation4], %s2261_s11 }
  0x54   : > { %s2265_s9 = scalar_lea.vmem (!%p2221_p11), [#allocation3], %s1717_s23  ;;  %p2546_p8 = scmp.ne.s32.totalorder (!%p2221_p11), %s2538_s13, 0 }
  0x59   : > { %2019 = dma.done.wait (%p2546_p8), %s346_s19, 512  }
  0x5a   : > { %2021 = vsyncadd (%p2546_p8), %s346_s19, 4294966784  ;;  %s1718_s3 = sshll.u32 %s2261_s11, 9  ;;  %s355_s15 = scalar_lea.sflag [#allocation7], %s2261_s11 }
  0x5b   : > { %s2273_s17 = scalar_lea.vmem [#allocation6], %s1718_s3 }
  0x5c   : > { %2023 = dma.done.wait (%p2546_p8), %s355_s15, 8192  }
  0x5d   : > { %2025 = vsyncadd (%p2546_p8), %s355_s15, 4294959104  ;;  %v2060_v0 = vmov 1   ;;  %v2061_v1 = vmov 0   ;;  %v440_v2 = vld [vmem:[%s2524_s0] sm:$0xff]  ;;  %v441_v3 = vld [vmem:[%s2524_s0 + $0x8] sm:$0xff]  ;;  %v2062_v6 = vmov 2   ;;  %v465_v39 = vlaneseq }
  0x5e   : > { %1896 = vset.pattern.permute.xlu1 %v2060_v0  ;;  %1895 = vset.pattern.permute.xlu0 %v2061_v1  ;;  %v442_v4 = vld [vmem:[%s2524_s0 + $0x10] sm:$0xff]  ;;  %v443_v5 = vld [vmem:[%s2524_s0 + $0x18] sm:$0xff]  ;;  %v1902_v7 = vld [vmem:[%s2265_s9] sm:$0xff]   ;;  %p419_p0 = scmp.lt.s32.totalorder %s2044_s27, 1  ;;  %vm593_vm2 = vcmask 523264   ;;  %vm1504_vm9 = vcmask 1041409  }
  0x5f   : > { %1121 = vmatprep.mubr.bf16.mxu1 %v2061_v1  ;;  %474 = vperm.xlu1 %1896, %v440_v2   ;;  %v1903_v8 = vld [vmem:[%s2265_s9 + $0x8] sm:$0xff]   ;;  %v1904_v9 = vld [vmem:[%s2265_s9 + $0x10] sm:$0xff]   ;;  %v1905_v10 = vld [vmem:[%s2265_s9 + $0x18] sm:$0xff]   ;;  %v2325_v42 = vshrl.u32 %v465_v39, 7  ;;  %vm1506_vm10 = vcmask 1043459   ;;  %vm1508_vm11 = vcmask 1045509  }
  0x60   : > { %447 = vperm.xlu0 %1895, %v440_v2   ;;  %1808 = vmatprep.subr.bf16.mxu0 %v1902_v7  ;;  %v663_v11 = vld [vmem:[%s2273_s17] sm:$0xff]  ;;  %v2301_v13 = vld [vmem:[%s2273_s17 + $0x8] sm:$0xff]  ;;  %s2322_s12 = scalar_select %p419_p0, %s2044_s27, 1  ;;  %vm1510_vm12 = vcmask 1047559  }
  0x61   : > { %1809 = vmatpush3.bf16.msra.mxu0 %v1902_v7  ;;  %v667_v12 = vld [vmem:[%s2273_s17 + $0x20] sm:$0xff]  ;;  %v2304_v15 = vld [vmem:[%s2273_s17 + $0x28] sm:$0xff]  ;;  %v491_v45 = vsub.s32 1, %v2325_v42  ;;  %v467_v46 = vsub.s32 0, %v2325_v42  ;;  %v519_v50 = vsub.s32 2, %v2325_v42  ;;  %s1801_s19 = sshll.u32 %s2044_s27, 8 }
  0x62   : > { %1810 = vmatprep.subr.bf16.mxu0 %v1903_v8  ;;  %v1731_v14 = vcombine.high %v663_v11, %v667_v12  ;;  %v1730_v16 = vcombine.low %v663_v11, %v667_v12  ;;  %v671_v17 = vld [vmem:[%s2273_s17 + $0x40] sm:$0xff]  ;;  %v1732_v19 = vcombine.low %v2301_v13, %v2304_v15  ;;  %v1733_v20 = vcombine.high %v2301_v13, %v2304_v15  ;;  %s1720_s23 = sshll.u32 %s2322_s12, 2  ;;  %s425_s18 = scalar_lea.vmem %s2526_s2, %s2322_s12  ;;  %v684_v39 = vld [vmem:[%s2273_s17 + $0xa8] sm:$0xff] }
  0x63   : > { %478 = vperm.xlu1 %1896, %v441_v3   ;;  %v675_v18 = vld [vmem:[%s2273_s17 + $0x60] sm:$0xff]  ;;  %s422_s3 = scalar_lea.vmem %s2525_s1, %s1720_s23  ;;  %s428_s13 = scalar_lea.vmem %s2528_s4, %s2322_s12 }
  0x64   : > { %452 = vperm.xlu0 %1895, %v441_v3   ;;  %v1739_v21 = vcombine.high %v671_v17, %v675_v18  ;;  %1089 = vmatprep.subr.bf16.mxu1 %v1731_v14  ;;  %v1738_v22 = vcombine.low %v671_v17, %v675_v18  ;;  %v679_v23 = vld [vmem:[%s2273_s17 + $0x80] sm:$0xff]  ;;  %s2473_s8 = scalar_lea.hbm %s2531_s7, %s1801_s19  ;;  %s1533_s27 = scalar_lea.sflag [#allocation5], %s2261_s11 }
  0x65   : > { %1811 = vmatpush3.bf16.msra.mxu0 %v1903_v8  ;;  %1090 = vmatpush1.bf16.msra.mxu1 %v1730_v16  ;;  %v683_v24 = vld [vmem:[%s2273_s17 + $0xa0] sm:$0xff]  ;;  %p2547_p11 = scmp.ne.s32.totalorder %s2539_s14, 0  ;;  %s2064_s22 = smov [#allocation8]  }
  0x66   : > { %1812 = vmatprep.subr.bf16.mxu0 %v1904_v9  ;;  %1091 = vmatprep.subr.bf16.mxu1 %v1739_v21  ;;  %v1747_v25 = vcombine.high %v679_v23, %v683_v24  ;;  %v1746_v26 = vcombine.low %v679_v23, %v683_v24  ;;  %v687_v27 = vld [vmem:[%s2273_s17 + $0xc0] sm:$0xff]  ;;  %s1970_s21 = sshll.u32 %s2064_s22, 4  ;;  %s1971_s21 = int_to_ptr.vmem [resolvable:$false] %s1970_s21 }
  0x67   : > { %1897 = vset.pattern.permute.xlu1 %v2061_v1  ;;  %v691_v28 = vld [vmem:[%s2273_s17 + $0xe0] sm:$0xff] }
  0x68   : > { %457 = vperm.xlu0 %1895, %v442_v4   ;;  %462 = vperm.xlu1 %1897, %v443_v5   ;;  %v1755_v29 = vcombine.high %v687_v27, %v691_v28  ;;  %v1754_v30 = vcombine.low %v687_v27, %v691_v28  ;;  %v695_v31 = vld [vmem:[%s2273_s17 + $0x100] sm:$0xff] }
  0x69   : > { %1813 = vmatpush3.bf16.msra.mxu0 %v1904_v9  ;;  %1092 = vmatpush1.bf16.msra.mxu1 %v1738_v22  ;;  %v699_v32 = vld [vmem:[%s2273_s17 + $0x120] sm:$0xff] }
  0x6a   : > { %1814 = vmatprep.subr.bf16.mxu0 %v1905_v10  ;;  %1093 = vmatprep.subr.bf16.mxu1 %v1747_v25  ;;  %v1763_v33 = vcombine.high %v695_v31, %v699_v32  ;;  %v1762_v34 = vcombine.low %v695_v31, %v699_v32  ;;  %v703_v35 = vld [vmem:[%s2273_s17 + $0x140] sm:$0xff]  ;;  %v672_v32 = vld [vmem:[%s2273_s17 + $0x48] sm:$0xff] }
  0x6b   : > { %v707_v36 = vld [vmem:[%s2273_s17 + $0x160] sm:$0xff] }
  0x6c   : > { %1898 = vset.pattern.permute.xlu0 %v2060_v0  ;;  %1899 = vset.pattern.permute.xlu1 %v2060_v0  ;;  %v1771_v37 = vcombine.high %v703_v35, %v707_v36  ;;  %v1770_v38 = vcombine.low %v703_v35, %v707_v36  ;;  %v444_v48 = vld [vmem:[%s422_s3] sm:$0x7] }
  0x6d   : > { %482 = vperm.xlu0 %1898, %v442_v4   ;;  %486 = vperm.xlu1 %1899, %v443_v5   ;;  %v492_v51 = vrot.slane %v444_v48, %v491_v45  ;;  %v468_v52 = vrot.slane %v444_v48, %v467_v46  ;;  %v520_v57 = vrot.slane %v444_v48, %v519_v50 }
  0x6e   : > { %1815 = vmatpush3.bf16.msra.mxu0 %v1905_v10  ;;  %1094 = vmatpush1.bf16.msra.mxu1 %v1746_v26 }
  0x6f   : > { %1142 = vmatprep.subr.bf16.mxu0 %v1733_v20  ;;  %1095 = vmatprep.subr.bf16.mxu1 %v1755_v29 }
  0x71   : > { %1901 = vset.pattern.permute.xlu0 %v2062_v6  ;;  %1900 = vset.pattern.permute.xlu1 %v2062_v6 }
  0x72   : > { %506 = vperm.xlu0 %1901, %v441_v3   ;;  %502 = vperm.xlu1 %1900, %v440_v2   ;;  %v1722_v3 = vld [vmem:[%s425_s18] ss:$0 sm:$0xff] }
  0x73   : > { %1096 = vmatpush1.bf16.msra.mxu1 %v1754_v30 }
  0x74   : > { %1097 = vmatprep.subr.bf16.mxu1 %v1763_v33  ;;  %v676_v33 = vld [vmem:[%s2273_s17 + $0x68] sm:$0xff] }
  0x76   : > { %510 = vperm.xlu1 %1900, %v442_v4  }
  0x77   : > { %1098 = vmatpush1.bf16.msra.mxu1 %v1762_v34 }
  0x78   : > { %1099 = vmatprep.subr.bf16.mxu1 %v1771_v37  ;;  %v1741_v37 = vcombine.high %v672_v32, %v676_v33 }
  0x7a   : > { %514 = vperm.xlu1 %1900, %v443_v5  }
  0x7b   : > { %1100 = vmatpush1.bf16.msra.mxu1 %v1770_v38  ;;  %v680_v38 = vld [vmem:[%s2273_s17 + $0x88] sm:$0xff] }
  0xde   : > { %v475_v40 = vpop.permute.xlu1 %474 }
  0xdf   : > { %v448_v41 = vpop.permute.xlu0 %447  ;;  %v493_v58 = vmul.f32 %v492_v51, %v475_v40  ;;  %v1740_v40 = vcombine.low %v672_v32, %v676_v33  ;;  %v673_v32 = vld [vmem:[%s2273_s17 + $0x50] sm:$0xff] }
  0xe0   : > { %v469_v59 = vmul.f32 %v468_v52, %v448_v41  ;;  %v1749_v41 = vcombine.high %v680_v38, %v684_v39 }
  0xe2   : > { %v479_v43 = vpop.permute.xlu1 %478  ;;  %v497_v0 = vadd.f32 %v493_v58, %v469_v59  ;;  %v712_v58 = vld [vmem:[%s2273_s17 + $0x188] sm:$0xff] }
  0xe3   : > { %v453_v44 = vpop.permute.xlu0 %452  ;;  %v494_v55 = vmul.f32 %v492_v51, %v479_v43  ;;  %v688_v43 = vld [vmem:[%s2273_s17 + $0xc8] sm:$0xff] }
  0xe4   : > { %v470_v56 = vmul.f32 %v468_v52, %v453_v44  ;;  %v692_v44 = vld [vmem:[%s2273_s17 + $0xe8] sm:$0xff] }
  0xe5   : > { %v1757_v48 = vcombine.high %v688_v43, %v692_v44  ;;  %v1756_v13 = vcombine.low %v688_v43, %v692_v44 }
  0xe6   : > { %v498_v61 = vadd.f32 %v494_v55, %v470_v56  ;;  %v711_v56 = vld [vmem:[%s2273_s17 + $0x180] sm:$0xff] }
  0xe7   : > { %v458_v47 = vpop.permute.xlu0 %457  ;;  %v463_v49 = vpop.permute.xlu1 %462 }
  0xe8   : > { %v471_v6 = vmul.f32 %v468_v52, %v458_v47  ;;  %v472_v17 = vmul.f32 %v468_v52, %v463_v49  ;;  %v1748_v47 = vcombine.low %v680_v38, %v684_v39  ;;  %v696_v49 = vld [vmem:[%s2273_s17 + $0x108] sm:$0xff] }
  0xe9   : > { %v708_v52 = vld [vmem:[%s2273_s17 + $0x168] sm:$0xff] }
  0xec   : > { %v483_v53 = vpop.permute.xlu0 %482  ;;  %v487_v54 = vpop.permute.xlu1 %486 }
  0xed   : > { %v495_v2 = vmul.f32 %v492_v51, %v483_v53  ;;  %v496_v11 = vmul.f32 %v492_v51, %v487_v54  ;;  %v700_v51 = vld [vmem:[%s2273_s17 + $0x128] sm:$0xff] }
  0xee   : > { %v1765_v15 = vcombine.high %v696_v49, %v700_v51  ;;  %v1764_v53 = vcombine.low %v696_v49, %v700_v51  ;;  %v685_v49 = vld [vmem:[%s2273_s17 + $0xb0] sm:$0xff]  ;;  %v682_v51 = vld [vmem:[%s2273_s17 + $0x98] sm:$0xff] }
  0xef   : > { %v499_v10 = vadd.f32 %v495_v2, %v471_v6  ;;  %v500_v23 = vadd.f32 %v496_v11, %v472_v17  ;;  %v723_v2 = vld [vmem:[%s2273_s17 + $0x1e0] sm:$0xff]  ;;  %v666_v11 = vld [vmem:[%s2273_s17 + $0x18] sm:$0xff] }
  0xf1   : > { %v507_v60 = vpop.permute.xlu0 %506  ;;  %v503_v63 = vpop.permute.xlu1 %502 }
  0xf2   : > { %v522_v62 = vmul.f32 %v520_v57, %v507_v60  ;;  %v521_v4 = vmul.f32 %v520_v57, %v503_v63  ;;  %v716_v60 = vld [vmem:[%s2273_s17 + $0x1a8] sm:$0xff] }
  0xf4   : > { %v526_v5 = vadd.f32 %v522_v62, %v498_v61  ;;  %v525_v7 = vadd.f32 %v521_v4, %v497_v0  ;;  %v1780_v61 = vcombine.low %v712_v58, %v716_v60  ;;  %v1781_v62 = vcombine.high %v712_v58, %v716_v60  ;;  %v719_v0 = vld [vmem:[%s2273_s17 + $0x1c0] sm:$0xff] }
  0xf5   : > { %v511_v9 = vpop.permute.xlu1 %510  ;;  %v1787_v4 = vcombine.high %v719_v0, %v723_v2 }
  0xf6   : > { %v537_v8 = vadd.f32 %v1722_v3, %v526_v5  ;;  %v536_v12 = vadd.f32 %v1722_v3, %v525_v7  ;;  %v523_v14 = vmul.f32 %v520_v57, %v511_v9  ;;  %v724_v5 = vld [vmem:[%s2273_s17 + $0x1e8] sm:$0xff]  ;;  %v665_v9 = vld [vmem:[%s2273_s17 + $0x10] sm:$0xff] }
  0xf8   : > { %vm541_vm0 = vcmp.gt.f32.partialorder %v537_v8, 0.0  ;;  %v545_v16 = vmul.f32 0.2, %v537_v8  ;;  %v527_v18 = vadd.f32 %v523_v14, %v499_v10  ;;  %vm540_vm1 = vcmp.gt.f32.partialorder %v536_v12, 0.0  ;;  %v669_v10 = vld [vmem:[%s2273_s17 + $0x30] sm:$0xff]  ;;  %v670_v14 = vld [vmem:[%s2273_s17 + $0x38] sm:$0xff] }
  0xf9   : > { %v544_v20 = vmul.f32 0.2, %v536_v12  ;;  %v515_v21 = vpop.permute.xlu1 %514  ;;  %v1736_v17 = vcombine.low %v666_v11, %v670_v14 }
  0xfa   : > { %v549_v22 = vsel %vm541_vm0, %v537_v8, %v545_v16  ;;  %v538_v24 = vadd.f32 %v1722_v3, %v527_v18  ;;  %v524_v25 = vmul.f32 %v520_v57, %v515_v21  ;;  %v715_v57 = vld [vmem:[%s2273_s17 + $0x1a0] sm:$0xff]  ;;  %v1786_v8 = vcombine.low %v719_v0, %v723_v2  ;;  %v698_v0 = vld [vmem:[%s2273_s17 + $0x118] sm:$0xff] }
  0xfb   : > { %v548_v26 = vsel %vm540_vm1, %v536_v12, %v544_v20  ;;  %v1779_v59 = vcombine.high %v711_v56, %v715_v57  ;;  %v1778_v63 = vcombine.low %v711_v56, %v715_v57  ;;  %v1735_v12 = vcombine.high %v665_v9, %v669_v10  ;;  %v1723_v20 = vld [vmem:[%s428_s13] ss:$0 sm:$0xff]  ;;  %v690_v56 = vld [vmem:[%s2273_s17 + $0xd8] sm:$0xff]  ;;  %s1972_s13 = scalar_lea.vmem %s1971_s21, 512 }
  0xfc   : > { %v552_v27 = vpack.c.bf16 %v549_v22, %v548_v26  ;;  %v528_v28 = vadd.f32 %v524_v25, %v500_v23  ;;  %v546_v29 = vmul.f32 0.2, %v538_v24  ;;  %vm542_vm3 = vcmp.gt.f32.partialorder %v538_v24, 0.0  ;;  %v694_v57 = vld [vmem:[%s2273_s17 + $0xf8] sm:$0xff] }
  0xfd   : > { %1101 = vmatprep.subr.bf16.mxu1 %v1779_v59  ;;  %v1734_v16 = vcombine.low %v665_v9, %v669_v10  ;;  %v1737_v18 = vcombine.high %v666_v11, %v670_v14  ;;  %v702_v2 = vld [vmem:[%s2273_s17 + $0x138] sm:$0xff] }
  0xfe   : > { %1816 = vmatprep.mubr.msk.bf16.mxu0 %vm593_vm2, %v552_v27  ;;  %v539_v30 = vadd.f32 %v1722_v3, %v528_v28  ;;  %v550_v34 = vsel %vm542_vm3, %v538_v24, %v546_v29  ;;  %1102 = vmatpush1.bf16.msra.mxu1 %v1778_v63  ;;  %v720_v3 = vld [vmem:[%s2273_s17 + $0x1c8] sm:$0xff]  ;;  %v701_v63 = vld [vmem:[%s2273_s17 + $0x130] sm:$0xff]  ;;  %v706_v9 = vld [vmem:[%s2273_s17 + $0x158] sm:$0xff] }
  0xff   : > { %v1788_v6 = vcombine.low %v720_v3, %v724_v5  ;;  %v1789_v7 = vcombine.high %v720_v3, %v724_v5  ;;  %1103 = vmatprep.subr.bf16.mxu1 %v1787_v4  ;;  %v1760_v4 = vcombine.low %v690_v56, %v694_v57  ;;  %v710_v10 = vld [vmem:[%s2273_s17 + $0x178] sm:$0xff] }
 0x100   : > { %vm543_vm4 = vcmp.gt.f32.partialorder %v539_v30, 0.0  ;;  %v547_v31 = vmul.f32 0.2, %v539_v30 }
 0x102   : > { %v551_v35 = vsel %vm543_vm4, %v539_v30, %v547_v31  ;;  %1104 = vmatpush1.bf16.msra.mxu1 %v1786_v8  ;;  %v709_v8 = vld [vmem:[%s2273_s17 + $0x170] sm:$0xff] }
 0x103   : > { %v553_v36 = vpack.c.bf16 %v551_v35, %v550_v34  ;;  %1195 = vmatprep.subr.bf16.mxu1 %v1735_v12  ;;  %v677_v34 = vld [vmem:[%s2273_s17 + $0x70] sm:$0xff]  ;;  %v674_v35 = vld [vmem:[%s2273_s17 + $0x58] sm:$0xff]  ;;  %v1768_v12 = vcombine.low %v698_v0, %v702_v2 }
 0x104   : > { %v1743_v44 = vcombine.high %v673_v32, %v677_v34 }
 0x105   : > { %1817 = vmatmul.mubr.msk.bf16.vlgmr.msra.gmra.mrb[0].mxu0 %vm593_vm2, %v553_v36  ;;  %v678_v36 = vld [vmem:[%s2273_s17 + $0x78] sm:$0xff] }
 0x106   : > { %1143 = vmatpush1.bf16.msra.mxu0 %v1732_v19  ;;  %1174 = vmatprep.mubr.bf16.mxu0 %v2061_v1  ;;  %v704_v19 = vld [vmem:[%s2273_s17 + $0x148] sm:$0xff] }
 0x107   : > { %1144 = vmatprep.subr.bf16.mxu0 %v1741_v37  ;;  %v1773_v54 = vcombine.high %v704_v19, %v708_v52  ;;  %v1772_v55 = vcombine.low %v704_v19, %v708_v52  ;;  %v1744_v19 = vcombine.low %v674_v35, %v678_v36 }
 0x10a   : > { %1145 = vmatpush1.bf16.msra.mxu0 %v1740_v40 }
 0x10b   : > { %1146 = vmatprep.subr.bf16.mxu0 %v1749_v41 }
 0x10e   : > { %1147 = vmatpush1.bf16.msra.mxu0 %v1748_v47  ;;  %v1745_v47 = vcombine.high %v674_v35, %v678_v36 }
 0x10f   : > { %1148 = vmatprep.subr.bf16.mxu0 %v1757_v48  ;;  %v681_v48 = vld [vmem:[%s2273_s17 + $0x90] sm:$0xff] }
 0x110   : > { %v1751_v52 = vcombine.high %v681_v48, %v685_v49  ;;  %v1750_v58 = vcombine.low %v681_v48, %v685_v49 }
 0x112   : > { %1149 = vmatpush1.bf16.msra.mxu0 %v1756_v13  ;;  %v686_v13 = vld [vmem:[%s2273_s17 + $0xb8] sm:$0xff] }
 0x113   : > { %1150 = vmatprep.subr.bf16.mxu0 %v1765_v15  ;;  %v1742_v15 = vcombine.low %v673_v32, %v677_v34  ;;  %v1752_v59 = vcombine.low %v682_v51, %v686_v13 }
 0x116   : > { %1151 = vmatpush1.bf16.msra.mxu0 %v1764_v53  ;;  %v1753_v53 = vcombine.high %v682_v51, %v686_v13 }
 0x117   : > { %1152 = vmatprep.subr.bf16.mxu0 %v1773_v54  ;;  %v689_v54 = vld [vmem:[%s2273_s17 + $0xd0] sm:$0xff] }
 0x11a   : > { %1153 = vmatpush1.bf16.msra.mxu0 %v1772_v55  ;;  %v693_v55 = vld [vmem:[%s2273_s17 + $0xf0] sm:$0xff] }
 0x11b   : > { %1154 = vmatprep.subr.bf16.mxu0 %v1781_v62  ;;  %v1759_v60 = vcombine.high %v689_v54, %v693_v55  ;;  %v697_v62 = vld [vmem:[%s2273_s17 + $0x110] sm:$0xff]  ;;  %v1758_v3 = vcombine.low %v689_v54, %v693_v55 }
 0x11c   : > { %v1767_v5 = vcombine.high %v697_v62, %v701_v63  ;;  %v1766_v11 = vcombine.low %v697_v62, %v701_v63 }
 0x11e   : > { %1155 = vmatpush1.bf16.msra.mxu0 %v1780_v61  ;;  %v1761_v61 = vcombine.high %v690_v56, %v694_v57 }
 0x11f   : > { %1156 = vmatprep.subr.bf16.mxu0 %v1789_v7  ;;  %v705_v7 = vld [vmem:[%s2273_s17 + $0x150] sm:$0xff] }
 0x120   : > { %v1775_v14 = vcombine.high %v705_v7, %v709_v8 }
 0x122   : > { %1157 = vmatpush1.bf16.msra.mxu0 %v1788_v6  ;;  %v1769_v6 = vcombine.high %v698_v0, %v702_v2 }
 0x123   : > { %1248 = vmatprep.subr.bf16.mxu0 %v1737_v18  ;;  %v717_v18 = vld [vmem:[%s2273_s17 + $0x1b0] sm:$0xff] }
 0x1d8   : > { %v1818_v21 = vpop.f32.mrb[0].mxu0 }
 0x1d9   : > { %v643_v22 = vadd.f32 %v1818_v21, %v1723_v20  ;;  %v634_v23 = vpop.f32.mrb[1].mxu0  ;;  %v718_v21 = vld [vmem:[%s2273_s17 + $0x1b8] sm:$0xff] }
 0x1da   : > { %v635_v24 = vadd.f32 %v1723_v20, %v634_v23  ;;  %v1819_v25 = vpop.f32.mrb[2].mxu0  ;;  %v1776_v23 = vcombine.low %v706_v9, %v710_v10 }
 0x1db   : > { %v655_v26 = vmul.f32 0.2, %v643_v22  ;;  %v646_v27 = vadd.f32 %v1819_v25, %v1723_v20  ;;  %v637_v28 = vpop.f32.mrb[3].mxu0  ;;  %vm651_vm5 = vcmp.gt.f32.partialorder %v643_v22, 0.0 }
 0x1dc   : > { %v653_v29 = vmul.f32 0.2, %v635_v24  ;;  %v638_v30 = vadd.f32 %v1723_v20, %v637_v28  ;;  %vm649_vm6 = vcmp.gt.f32.partialorder %v635_v24, 0.0  ;;  %v714_v20 = vld [vmem:[%s2273_s17 + $0x198] sm:$0xff] }
 0x1dd   : > { %vm652_vm7 = vcmp.gt.f32.partialorder %v646_v27, 0.0  ;;  %v656_v31 = vmul.f32 0.2, %v646_v27  ;;  %v659_v37 = vsel %vm651_vm5, %v643_v22, %v655_v26  ;;  %v1774_v22 = vcombine.low %v705_v7, %v709_v8  ;;  %v721_v26 = vld [vmem:[%s2273_s17 + $0x1d0] sm:$0xff]  ;;  %v722_v28 = vld [vmem:[%s2273_s17 + $0x1d8] sm:$0xff] }
 0x1de   : > { %vm650_vm8 = vcmp.gt.f32.partialorder %v638_v30, 0.0  ;;  %v654_v33 = vmul.f32 0.2, %v638_v30  ;;  %v657_v39 = vsel %vm649_vm6, %v635_v24, %v653_v29  ;;  %v1785_v25 = vcombine.high %v714_v20, %v718_v21  ;;  %v726_v29 = vld [vmem:[%s2273_s17 + $0x1f8] sm:$0xff] }
 0x1df   : > { %v660_v38 = vsel %vm652_vm7, %v646_v27, %v656_v31  ;;  %v725_v27 = vld [vmem:[%s2273_s17 + $0x1f0] sm:$0xff]  ;;  %v1784_v31 = vcombine.low %v714_v20, %v718_v21  ;;  %v1792_v35 = vcombine.low %v722_v28, %v726_v29 }
 0x1e0   : > { %v2379_v40 = vpack.c.bf16 %v660_v38, %v659_v37  ;;  %v658_v41 = vsel %vm650_vm8, %v638_v30, %v654_v33  ;;  %v1791_v32 = vcombine.high %v721_v26, %v725_v27  ;;  %v1793_v33 = vcombine.high %v722_v28, %v726_v29 }
 0x1e1   : > { %v2381_v43 = vpack.c.bf16 %v658_v41, %v657_v39  ;;  %v1790_v34 = vcombine.low %v721_v26, %v725_v27  ;;  %v743_v37 = vsub.s32 3, %v2325_v42  ;;  %v2063_v38 = vmov 1983009808  }
 0x1e2   : > { %v1434_v39 = vunpack.c.l.s4 %v2063_v38 }
 0x1e3   : > { %1122 = vmatmul.mubr.bf16.vlgmr.msra.gmra.mrb[0].mxu1 %v2381_v43  ;;  %1175 = vmatmul.mubr.bf16.vlgmr.msra.gmra.mrb[4].mxu0 %v2381_v43 }
 0x1e4   : > { %1196 = vmatpush1.bf16.msra.mxu1 %v1734_v16  ;;  %1249 = vmatpush1.bf16.msra.mxu0 %v1736_v17  ;;  %v1777_v16 = vcombine.high %v706_v9, %v710_v10  ;;  %v713_v17 = vld [vmem:[%s2273_s17 + $0x190] sm:$0xff]  ;;  %s1721_s17 = sshll.u32 %s2322_s12, 3  ;;  %s1719_s12 = sshll.u32 %s2261_s11, 4 }
 0x1e5   : > { %1197 = vmatprep.subr.bf16.mxu1 %v1743_v44  ;;  %1250 = vmatprep.subr.bf16.mxu0 %v1745_v47  ;;  %v1783_v24 = vcombine.high %v713_v17, %v717_v18  ;;  %v1782_v30 = vcombine.low %v713_v17, %v717_v18  ;;  %s432_s30 = scalar_lea.vmem %s2530_s6, %s1721_s17  ;;  %s2458_s23 = scalar_lea.vmem [#allocation8], %s1719_s12 }
 0x1e6   : > { %1131 = vmatprep.mubr.bf16.mxu1 %v2061_v1  ;;  %1184 = vmatprep.mubr.bf16.mxu0 %v2061_v1  ;;  %v2425_v36 = vld [vmem:[%s432_s30] sm:$0xff]  ;;  %s1547_s9 = sshll.u32 %s2458_s23, 4  ;;  %s2475_s9 = int_to_ptr.vmem [resolvable:$true] %s1547_s9 }
 0x1e7   : > { %v732_v41 = vrot.slane %v2425_v36, %v467_v46  ;;  %v736_v44 = vrot.slane %v2425_v36, %v491_v45  ;;  %v744_v47 = vrot.slane %v2425_v36, %v743_v37  ;;  %s1966_s18 = scalar_lea.vmem %s2475_s9, 256  ;;  %p1973_p10 = scmp.lt.s32.totalorder %s2475_s9, %s1971_s21 }
 0x1e8   : > { %1198 = vmatpush1.bf16.msra.mxu1 %v1742_v15  ;;  %1251 = vmatpush1.bf16.msra.mxu0 %v1744_v19  ;;  %v1435_v15 = vunpack.c.0.s8 %v1434_v39  ;;  %p1967_p3 = scmp.ne.s32.totalorder %s2475_s9, %s1966_s18  ;;  %p1974_p12 = scmp.lt.s32.totalorder %s1972_s13, %s1966_s18 }
 0x1e9   : > { %1199 = vmatprep.subr.bf16.mxu1 %v1751_v52  ;;  %1252 = vmatprep.subr.bf16.mxu0 %v1753_v53 }
 0x1ea   : > { %v2439_v2 = vsub.s32 %v1435_v15, %v2325_v42  ;;  %p1968_p13 = pnand %p1967_p3, %p2547_p11  ;;  %p1975_p9 = por %p1974_p12, %p1973_p10 }
 0x1eb   : > { %1132 = vmatmul.mubr.bf16.gmra.mrb[4].mxu1 %v2379_v40  ;;  %1185 = vmatmul.mubr.bf16.gmra.mrb[8].mxu0 %v2379_v40 }
 0x1ec   : > { %1200 = vmatpush1.bf16.msra.mxu1 %v1750_v58  ;;  %1253 = vmatpush1.bf16.msra.mxu0 %v1752_v59  ;;  %p1969_p7 = pneg %p1968_p13 }
 0x1ed   : > { %1201 = vmatprep.subr.bf16.mxu1 %v1759_v60  ;;  %1254 = vmatprep.subr.bf16.mxu0 %v1761_v61 }
 0x1ee   : > { %1227 = vmatprep.mubr.bf16.mxu1 %v2061_v1  ;;  %1280 = vmatprep.mubr.bf16.mxu0 %v2061_v1  ;;  %p1976_p1 = pnand %p1975_p9, %p1969_p7 }
 0x1f0   : > { %1202 = vmatpush1.bf16.msra.mxu1 %v1758_v3  ;;  %1255 = vmatpush1.bf16.msra.mxu0 %v1760_v4 }
 0x1f1   : > { %1203 = vmatprep.subr.bf16.mxu1 %v1767_v5  ;;  %1256 = vmatprep.subr.bf16.mxu0 %v1769_v6 }
 0x1f4   : > { %1204 = vmatpush1.bf16.msra.mxu1 %v1766_v11  ;;  %1257 = vmatpush1.bf16.msra.mxu0 %v1768_v12 }
 0x1f5   : > { %1205 = vmatprep.subr.bf16.mxu1 %v1775_v14  ;;  %1258 = vmatprep.subr.bf16.mxu0 %v1777_v16 }
 0x1f8   : > { %1206 = vmatpush1.bf16.msra.mxu1 %v1774_v22  ;;  %1259 = vmatpush1.bf16.msra.mxu0 %v1776_v23 }
 0x1f9   : > { %1207 = vmatprep.subr.bf16.mxu1 %v1783_v24  ;;  %1260 = vmatprep.subr.bf16.mxu0 %v1785_v25 }
 0x1fc   : > { %1208 = vmatpush1.bf16.msra.mxu1 %v1782_v30  ;;  %1261 = vmatpush1.bf16.msra.mxu0 %v1784_v31 }
 0x1fd   : > { %1209 = vmatprep.subr.bf16.mxu1 %v1791_v32  ;;  %1262 = vmatprep.subr.bf16.mxu0 %v1793_v33 }
 0x200   : > { %1210 = vmatpush1.bf16.msra.mxu1 %v1790_v34  ;;  %1263 = vmatpush1.bf16.msra.mxu0 %v1792_v35 }
 0x203   : > { %1228 = vmatmul.mubr.bf16.vlgmr.msra.gmra.mrb[8].mxu1 %v2381_v43  ;;  %1281 = vmatmul.mubr.bf16.vlgmr.msra.gmra.mrb[12].mxu0 %v2381_v43 }
 0x204   : > { %1237 = vmatprep.mubr.bf16.mxu1 %v2061_v1  ;;  %1290 = vmatprep.mubr.bf16.mxu0 %v2061_v1  ;;  %v740_v1 = vrot.slane %v2425_v36, %v519_v50 }
 0x20b   : > { %1238 = vmatmul.mubr.bf16.gmra.mrb[12].mxu1 %v2379_v40  ;;  %1291 = vmatmul.mubr.bf16.gmra.mrb[16].mxu0 %v2379_v40 }
 0x2b6   : > { %v1123_v40 = vpop.f32.mrb[0].mxu1  ;;  %v1176_v43 = vpop.f32.mrb[4].mxu0 }
 0x2b7   : > { %v1125_v48 = vpop.f32.mrb[1].mxu1  ;;  %v1178_v49 = vpop.f32.mrb[5].mxu0  ;;  %v1124_v19 = vadd.f32 %v1123_v40, %v732_v41  ;;  %v1177_v52 = vadd.f32 %v1176_v43, %v740_v1 }
 0x2b8   : > { %v1127_v51 = vpop.f32.mrb[2].mxu1  ;;  %v1180_v13 = vpop.f32.mrb[6].mxu0  ;;  %v1126_v50 = vadd.f32 %v1125_v48, %v736_v44  ;;  %v1179_v56 = vadd.f32 %v1178_v49, %v744_v47 }
 0x2b9   : > { %v1128_v46 = vadd.f32 %v1127_v51, %v732_v41  ;;  %v1181_v53 = vadd.f32 %v1180_v13, %v740_v1  ;;  %v1129_v54 = vpop.f32.mrb[3].mxu1  ;;  %v1182_v55 = vpop.f32.mrb[7].mxu0 }
 0x2ba   : > { %v1130_v57 = vadd.f32 %v1129_v54, %v736_v44  ;;  %v1183_v58 = vadd.f32 %v1182_v55, %v744_v47 }
 0x2bb   : > { %v1303_v59 = vmax.f32 %v1124_v19, %v1128_v46  ;;  %v1317_v60 = vmax.f32 %v1177_v52, %v1181_v53 }
 0x2bc   : > { %v1310_v45 = vmax.f32 %v1126_v50, %v1130_v57  ;;  %v1324_v61 = vmax.f32 %v1179_v56, %v1183_v58 }
 0x2bd   : > { %v1304_v62 = vrot.slane %v1303_v59, 4  ;;  %v1318_v63 = vrot.slane %v1317_v60, 4 }
 0x2be   : > { %v1311_v0 = vrot.slane %v1310_v45, 4  ;;  %v1325_v3 = vrot.slane %v1324_v61, 4  ;;  %v1133_v4 = vpop.f32.mrb[4].mxu1  ;;  %v1186_v5 = vpop.f32.mrb[8].mxu0 }
 0x2bf   : > { %v1305_v6 = vmax.f32 %v1303_v59, %v1304_v62  ;;  %v1319_v7 = vmax.f32 %v1317_v60, %v1318_v63  ;;  %v1134_v8 = vadd.f32 %v1133_v4, %v732_v41  ;;  %v1187_v9 = vadd.f32 %v1186_v5, %v740_v1  ;;  %v1135_v10 = vpop.f32.mrb[5].mxu1  ;;  %v1188_v11 = vpop.f32.mrb[9].mxu0 }
 0x2c0   : > { %v1312_v12 = vmax.f32 %v1310_v45, %v1311_v0  ;;  %v1326_v14 = vmax.f32 %v1324_v61, %v1325_v3  ;;  %v1136_v16 = vadd.f32 %v1135_v10, %v736_v44  ;;  %v1189_v17 = vadd.f32 %v1188_v11, %v744_v47  ;;  %v1137_v18 = vpop.f32.mrb[6].mxu1  ;;  %v1190_v20 = vpop.f32.mrb[10].mxu0 }
 0x2c1   : > { %v1306_v21 = vrot.slane %v1305_v6, 2  ;;  %v1320_v22 = vrot.slane %v1319_v7, 2  ;;  %v1138_v23 = vadd.f32 %v1137_v18, %v732_v41  ;;  %v1191_v24 = vadd.f32 %v1190_v20, %v740_v1  ;;  %v1139_v25 = vpop.f32.mrb[7].mxu1  ;;  %v1192_v26 = vpop.f32.mrb[11].mxu0 }
 0x2c2   : > { %v1313_v27 = vrot.slane %v1312_v12, 2  ;;  %v1327_v28 = vrot.slane %v1326_v14, 2  ;;  %v1140_v29 = vadd.f32 %v1139_v25, %v736_v44  ;;  %v1193_v30 = vadd.f32 %v1192_v26, %v744_v47 }
 0x2c3   : > { %v1307_v31 = vmax.f32 %v1305_v6, %v1306_v21  ;;  %v1321_v32 = vmax.f32 %v1319_v7, %v1320_v22  ;;  %v1359_v33 = vmax.f32 %v1134_v8, %v1138_v23  ;;  %v1373_v34 = vmax.f32 %v1187_v9, %v1191_v24 }
 0x2c4   : > { %v1314_v35 = vmax.f32 %v1312_v12, %v1313_v27  ;;  %v1328_v37 = vmax.f32 %v1326_v14, %v1327_v28  ;;  %v1366_v38 = vmax.f32 %v1136_v16, %v1140_v29  ;;  %v1380_v39 = vmax.f32 %v1189_v17, %v1193_v30 }
 0x2c5   : > { %v1308_v40 = vrot.slane %v1307_v31, 1  ;;  %v1322_v43 = vrot.slane %v1321_v32, 1  ;;  %v1360_v48 = vrot.slane %v1359_v33, 4  ;;  %v1374_v49 = vrot.slane %v1373_v34, 4 }
 0x2c6   : > { %v1315_v41 = vrot.slane %v1314_v35, 1  ;;  %v1329_v1 = vrot.slane %v1328_v37, 1  ;;  %v1367_v51 = vrot.slane %v1366_v38, 4  ;;  %v1381_v13 = vrot.slane %v1380_v39, 4 }
 0x2c7   : > { %v1309_v15 = vmax.f32 %v1307_v31, %v1308_v40  ;;  %v1323_v19 = vmax.f32 %v1321_v32, %v1322_v43  ;;  %v1361_v44 = vmax.f32 %v1359_v33, %v1360_v48  ;;  %v1375_v47 = vmax.f32 %v1373_v34, %v1374_v49 }
 0x2c8   : > { %v1316_v52 = vmax.f32 %v1314_v35, %v1315_v41  ;;  %v1330_v46 = vmax.f32 %v1328_v37, %v1329_v1  ;;  %v1368_v53 = vmax.f32 %v1366_v38, %v1367_v51  ;;  %v1382_v54 = vmax.f32 %v1380_v39, %v1381_v13 }
 0x2c9   : > { %v1362_v55 = vrot.slane %v1361_v44, 2  ;;  %v1376_v50 = vrot.slane %v1375_v47, 2  ;;  %v747_v12 = vsub.s32 4, %v2325_v42  ;;  %v755_v14 = vsub.s32 6, %v2325_v42 }
 0x2ca   : > { %v1431_v56 = vcombine.low %v1309_v15, %v1316_v52  ;;  %v1432_v57 = vcombine.low %v1323_v19, %v1330_v46  ;;  %v1369_v58 = vrot.slane %v1368_v53, 2  ;;  %v1383_v59 = vrot.slane %v1382_v54, 2 }
 0x2cb   : > { %v1363_v60 = vmax.f32 %v1361_v44, %v1362_v55  ;;  %v1377_v45 = vmax.f32 %v1375_v47, %v1376_v50  ;;  %v751_v16 = vsub.s32 5, %v2325_v42  ;;  %v759_v20 = vsub.s32 7, %v2325_v42 }
 0x2cc   : > { %v1439_v61 = vrot.slane %v1431_v56, %v2439_v2  ;;  %v1446_v62 = vrot.slane %v1432_v57, %v2439_v2  ;;  %v1370_v63 = vmax.f32 %v1368_v53, %v1369_v58  ;;  %v1384_v0 = vmax.f32 %v1382_v54, %v1383_v59 }
 0x2cd   : > { %v1364_v3 = vrot.slane %v1363_v60, 1  ;;  %v1378_v4 = vrot.slane %v1377_v45, 1  ;;  %v748_v23 = vrot.slane %v2425_v36, %v747_v12  ;;  %v756_v24 = vrot.slane %v2425_v36, %v755_v14 }
 0x2ce   : > { %v1447_v5 = vcombine.low %v1439_v61, %v1446_v62  ;;  %v1371_v6 = vrot.slane %v1370_v63, 1  ;;  %v1385_v7 = vrot.slane %v1384_v0, 1  ;;  %v752_v25 = vrot.slane %v2425_v36, %v751_v16 }
 0x2cf   : > { %v1365_v8 = vmax.f32 %v1363_v60, %v1364_v3  ;;  %v1379_v9 = vmax.f32 %v1377_v45, %v1378_v4  ;;  %v760_v29 = vrot.slane %v2425_v36, %v759_v20 }
 0x2d0   : > { %v1372_v10 = vmax.f32 %v1370_v63, %v1371_v6  ;;  %v1386_v11 = vmax.f32 %v1384_v0, %v1385_v7 }
 0x2d2   : > { %v1465_v17 = vcombine.low %v1365_v8, %v1372_v10  ;;  %v1466_v18 = vcombine.low %v1379_v9, %v1386_v11 }
 0x2d4   : > { %v1473_v21 = vrot.slane %v1465_v17, %v2439_v2  ;;  %v1480_v22 = vrot.slane %v1466_v18, %v2439_v2 }
 0x2d6   : > { %v1481_v26 = vcombine.low %v1473_v21, %v1480_v22  ;;  %v1229_v27 = vpop.f32.mrb[8].mxu1  ;;  %v1282_v28 = vpop.f32.mrb[12].mxu0 }
 0x2d7   : > { %v1231_v30 = vpop.f32.mrb[9].mxu1  ;;  %v1284_v31 = vpop.f32.mrb[13].mxu0  ;;  %v1230_v32 = vadd.f32 %v1229_v27, %v748_v23  ;;  %v1283_v35 = vadd.f32 %v1282_v28, %v756_v24 }
 0x2d8   : > { %v1503_v42 = vrot.slane %v1481_v26, 7  ;;  %v1233_v33 = vpop.f32.mrb[10].mxu1  ;;  %v1286_v34 = vpop.f32.mrb[14].mxu0  ;;  %v1232_v37 = vadd.f32 %v1231_v30, %v752_v25  ;;  %v1285_v48 = vadd.f32 %v1284_v31, %v760_v29 }
 0x2d9   : > { %v1234_v38 = vadd.f32 %v1233_v33, %v748_v23  ;;  %v1287_v39 = vadd.f32 %v1286_v34, %v756_v24  ;;  %v1235_v40 = vpop.f32.mrb[11].mxu1  ;;  %v1288_v43 = vpop.f32.mrb[15].mxu0 }
 0x2da   : > { %v1236_v49 = vadd.f32 %v1235_v40, %v752_v25  ;;  %v1289_v36 = vadd.f32 %v1288_v43, %v760_v29  ;;  %v1505_v41 = vsel %vm1504_vm9, %v1503_v42, %v1447_v5 }
 0x2db   : > { %v1331_v1 = vmax.f32 %v1230_v32, %v1234_v38  ;;  %v1345_v51 = vmax.f32 %v1283_v35, %v1287_v39  ;;  %v1507_v13 = vsel %vm1506_vm10, %v1503_v42, %v1505_v41 }
 0x2dc   : > { %v1338_v15 = vmax.f32 %v1232_v37, %v1236_v49  ;;  %v1352_v19 = vmax.f32 %v1285_v48, %v1289_v36  ;;  %v1509_v44 = vsel %vm1508_vm11, %v1503_v42, %v1507_v13 }
 0x2dd   : > { %v1332_v47 = vrot.slane %v1331_v1, 4  ;;  %v1346_v52 = vrot.slane %v1345_v51, 4  ;;  %v1511_v46 = vsel %vm1510_vm12, %v1503_v42, %v1509_v44 }
 0x2de   : > { %v1339_v53 = vrot.slane %v1338_v15, 4  ;;  %v1353_v54 = vrot.slane %v1352_v19, 4  ;;  %v1239_v55 = vpop.f32.mrb[12].mxu1  ;;  %v1292_v50 = vpop.f32.mrb[16].mxu0  ;;  %1530 = vst [vmem:[%s2458_s23] sm:$0xff] %v1511_v46 }
 0x2df   : > { %v1333_v56 = vmax.f32 %v1331_v1, %v1332_v47  ;;  %v1347_v57 = vmax.f32 %v1345_v51, %v1346_v52  ;;  %v1240_v58 = vadd.f32 %v1239_v55, %v748_v23  ;;  %v1293_v59 = vadd.f32 %v1292_v50, %v756_v24  ;;  %v1241_v60 = vpop.f32.mrb[13].mxu1  ;;  %v1294_v45 = vpop.f32.mrb[17].mxu0 }
 0x2e0   : > { %v1340_v61 = vmax.f32 %v1338_v15, %v1339_v53  ;;  %v1354_v62 = vmax.f32 %v1352_v19, %v1353_v54  ;;  %v1242_v63 = vadd.f32 %v1241_v60, %v752_v25  ;;  %v1295_v0 = vadd.f32 %v1294_v45, %v760_v29  ;;  %v1243_v3 = vpop.f32.mrb[14].mxu1  ;;  %v1296_v4 = vpop.f32.mrb[18].mxu0 }
 0x2e1   : > { %v1334_v5 = vrot.slane %v1333_v56, 2  ;;  %v1348_v6 = vrot.slane %v1347_v57, 2  ;;  %v1244_v7 = vadd.f32 %v1243_v3, %v748_v23  ;;  %v1297_v8 = vadd.f32 %v1296_v4, %v756_v24  ;;  %v1245_v9 = vpop.f32.mrb[15].mxu1  ;;  %v1298_v10 = vpop.f32.mrb[19].mxu0 }
 0x2e2   : > { %v1341_v11 = vrot.slane %v1340_v61, 2  ;;  %v1355_v12 = vrot.slane %v1354_v62, 2  ;;  %v1246_v14 = vadd.f32 %v1245_v9, %v752_v25  ;;  %v1299_v16 = vadd.f32 %v1298_v10, %v760_v29 }
 0x2e3   : > { %v1335_v17 = vmax.f32 %v1333_v56, %v1334_v5  ;;  %v1349_v18 = vmax.f32 %v1347_v57, %v1348_v6  ;;  %v1387_v20 = vmax.f32 %v1240_v58, %v1244_v7  ;;  %v1401_v21 = vmax.f32 %v1293_v59, %v1297_v8 }
 0x2e4   : > { %v1342_v22 = vmax.f32 %v1340_v61, %v1341_v11  ;;  %v1356_v26 = vmax.f32 %v1354_v62, %v1355_v12  ;;  %v1394_v27 = vmax.f32 %v1242_v63, %v1246_v14  ;;  %v1408_v28 = vmax.f32 %v1295_v0, %v1299_v16 }
 0x2e5   : > { %v1336_v30 = vrot.slane %v1335_v17, 1  ;;  %v1350_v31 = vrot.slane %v1349_v18, 1  ;;  %v1388_v42 = vrot.slane %v1387_v20, 4  ;;  %v1402_v32 = vrot.slane %v1401_v21, 4 }
 0x2e6   : > { %v1343_v23 = vrot.slane %v1342_v22, 1  ;;  %v1357_v24 = vrot.slane %v1356_v26, 1  ;;  %v1395_v33 = vrot.slane %v1394_v27, 4  ;;  %v1409_v34 = vrot.slane %v1408_v28, 4 }
 0x2e7   : > { %v1337_v35 = vmax.f32 %v1335_v17, %v1336_v30  ;;  %v1351_v37 = vmax.f32 %v1349_v18, %v1350_v31  ;;  %v1389_v25 = vmax.f32 %v1387_v20, %v1388_v42  ;;  %v1403_v29 = vmax.f32 %v1401_v21, %v1402_v32 }
 0x2e8   : > { %v1344_v38 = vmax.f32 %v1342_v22, %v1343_v23  ;;  %v1358_v39 = vmax.f32 %v1356_v26, %v1357_v24  ;;  %v1396_v40 = vmax.f32 %v1394_v27, %v1395_v33  ;;  %v1410_v43 = vmax.f32 %v1408_v28, %v1409_v34 }
 0x2e9   : > { %v1390_v48 = vrot.slane %v1389_v25, 2  ;;  %v1404_v49 = vrot.slane %v1403_v29, 2 }
 0x2ea   : > { %v1448_v36 = vcombine.low %v1337_v35, %v1344_v38  ;;  %v1449_v41 = vcombine.low %v1351_v37, %v1358_v39  ;;  %v1397_v1 = vrot.slane %v1396_v40, 2  ;;  %v1411_v51 = vrot.slane %v1410_v43, 2 }
 0x2eb   : > { %v1391_v13 = vmax.f32 %v1389_v25, %v1390_v48  ;;  %v1405_v15 = vmax.f32 %v1403_v29, %v1404_v49 }
 0x2ec   : > { %v1456_v19 = vrot.slane %v1448_v36, %v2439_v2  ;;  %v1463_v44 = vrot.slane %v1449_v41, %v2439_v2  ;;  %v1398_v47 = vmax.f32 %v1396_v40, %v1397_v1  ;;  %v1412_v52 = vmax.f32 %v1410_v43, %v1411_v51 }
 0x2ed   : > { %v1392_v46 = vrot.slane %v1391_v13, 1  ;;  %v1406_v53 = vrot.slane %v1405_v15, 1 }
 0x2ee   : > { %v1464_v54 = vcombine.low %v1456_v19, %v1463_v44  ;;  %v1399_v55 = vrot.slane %v1398_v47, 1  ;;  %v1413_v50 = vrot.slane %v1412_v52, 1 }
 0x2ef   : > { %v1393_v56 = vmax.f32 %v1391_v13, %v1392_v46  ;;  %v1407_v57 = vmax.f32 %v1405_v15, %v1406_v53 }
 0x2f0   : > { %v1400_v58 = vmax.f32 %v1398_v47, %v1399_v55  ;;  %v1414_v59 = vmax.f32 %v1412_v52, %v1413_v50 }
 0x2f2   : > { %v1482_v60 = vcombine.low %v1393_v56, %v1400_v58  ;;  %v1483_v45 = vcombine.low %v1407_v57, %v1414_v59 }
 0x2f4   : > { %v1490_v61 = vrot.slane %v1482_v60, %v2439_v2  ;;  %v1497_v62 = vrot.slane %v1483_v45, %v2439_v2 }
 0x2f6   : > { %v1498_v63 = vcombine.low %v1490_v61, %v1497_v62 }
 0x2f8   : > { %v1514_v0 = vrot.slane %v1498_v63, 7 }
 0x2fa   : > { %v1515_v3 = vsel %vm1504_vm9, %v1514_v0, %v1464_v54 }
 0x2fb   : > { %v1516_v4 = vsel %vm1506_vm10, %v1514_v0, %v1515_v3 }
 0x2fc   : > { %v1517_v5 = vsel %vm1508_vm11, %v1514_v0, %v1516_v4 }
 0x2fd   : > { %v1518_v2 = vsel %vm1510_vm12, %v1514_v0, %v1517_v5 }
 0x2fe   : > { %1531 = vst [vmem:[%s2458_s23 + $0x8] sm:$0xff] %v1518_v2 }
 0x2ff   : > { %1979 = shalt.err (!%p1976_p1)
}
 0x300   : > { %s1980_s11 = scalar_lea.hbm %s2473_s8, 256  ;;  %s1984_s10 = scalar_lea.hbm %s2531_s7, 512 }
 0x301   : > { %p1981_p6 = scmp.ne.s32.totalorder %s2473_s8, %s1980_s11  ;;  %p1985_p4 = scmp.lt.u32.totalorder %s2473_s8, %s2531_s7 }
 0x302   : > { %p1986_p8 = scmp.lt.u32.totalorder %s1984_s10, %s1980_s11  ;;  %p1988_p3 = scmp.lt.u32.totalorder %s1980_s11, %s2473_s8 }
 0x303   : > { %p1982_p2 = pnand %p1981_p6, %p2547_p11 }
 0x304   : > { %p1987_p0 = por %p1986_p8, %p1985_p4 }
 0x305   : > { %p1983_p5 = pneg %p1982_p2 }
 0x306   : > { %p1989_p13 = por %p1988_p3, %p1987_p0 }
 0x308   : > { %p1990_p7 = pnand %p1989_p13, %p1983_p5 }
 0x30a   : > { %1993 = shalt.err (!%p1990_p7)
}
 0x30b   : > { %1824 = dma.vmem_to_hbm [thread:$0]  (%p2547_p11), %s2475_s9, 256, %s2473_s8, %s1533_s27  }
 0x30c PF: > { %s1559_s23 = sand.u32 1, %s2032_s24   ;;  %p2548_p10 = scmp.ne.s32.totalorder %s2541_s16, 0 }
 0x30d   : > { %p2549_p12 = scmp.ge.s32.totalorder %s2052_s29, 2  ;;  %s1560_s19 = scalar_lea.sflag [#allocation5], %s1559_s23 }
 0x30f   : > { %p1834_p9 = pnand %p2549_p12, %p2548_p10 }
 0x311   : > { %2027 = dma.done.wait (!%p1834_p9), %s1560_s19, 256  }
 0x312   : > { %2029 = vsyncadd (!%p1834_p9), %s1560_s19, 4294967040  ;;  %s26_s29 = sadd.s32 1, %s2052_s29   ;;  %s2550_s14 = sld [smem:[#allocation13_spill]] }
 0x313   : > { %p23_p1 = scmp.ge.s32.totalorder %s26_s29, 4   ;;  %s2551_s3 = sld [smem:[#allocation12_spill]] }
 0x314   : > { %s2552_s24 = smov %s2036_s25  ;;  %s2553_s25 = smov %s2040_s26 }
 0x315   : > { %s2555_s27 = smov %s2048_s28  ;;  %25 = sbr.rel (!%p23_p1) target bundleno = 10 (0xa), region = 129 }
 0x318   : > { %s2554_s26 = smov %s2550_s14 }
 0x319   : > { %s2556_s28 = smov %s2551_s3 }
 0x31c   :  { %1565 = vsyncpa [#allocation4], 1 }
 0x31d   :  { %1567 = vsyncpa [#allocation4 + $0x1], 1 }
 0x31e   :  { %1568 = vsyncpa [#allocation7], 1 }
 0x31f   :  { %1570 = vsyncpa [#allocation7 + $0x1], 1 }
 0x320   :  { %1571 = vsyncpa [#allocation5], 1 }
 0x321   :  { %1573 = vsyncpa [#allocation5 + $0x1], 1 }

</bundles_post_ra>
